<compile_context>
chip_gen: v7x
topology: tpu7x:2x2x1
jax: 0.10.0
libtpu: 0.0.40
codegen_flags: <defaults>
</compile_context>

<pallas_src>
import functools

import jax
import jax.numpy as jnp
from jax.experimental import pallas as pl
from jax.experimental.pallas import tpu as pltpu

LANE = 128
SUBLANE = 8


def _num_tensorcores():
    """2 on chips whose Pallas device spans 2 TensorCores (v4/v5p/v7x), else 1."""
    try:
        kind = jax.devices()[0].device_kind.lower()
    except Exception:
        return 1
    if ("v7" in kind) or ("7x" in kind) or ("v4" in kind) or ("v5p" in kind):
        return 2
    return 1


def _content_loss_kernel(x_ref, t_ref, psum_ref, *, tm, chunk, n_rows,
                         per_core_blocks, needs_mask):
    """Accumulate per-lane partial sums of (x - t)^2 over one (tm, 128) tile.

    x_ref    : (tm, 128) input tile (VMEM)
    t_ref    : (tm, 128) raw target tile (VMEM)
    psum_ref : (8, 128) per-core partial-sum block, resident across the
               reduction axis (block index depends only on the parallel axis).
    """
    c = pl.program_id(0)   # core-parallel axis
    j = pl.program_id(1)   # reduction axis ("arbitrary")

    @pl.when(j == 0)
    def _init():
        psum_ref[...] = jnp.zeros_like(psum_ref)

    n_full = tm // chunk
    rem = tm % chunk        # static remainder sub-tile (multiple of 8 rows)

    def accumulate(row_start, masked):
        if masked:
            base_rows = jax.lax.broadcasted_iota(jnp.int32, (chunk, LANE), 0)

        def chunk_sum(r0, rows_in_chunk, base):
            xs = x_ref[pl.ds(r0, rows_in_chunk), :].astype(jnp.float32)
            ts = t_ref[pl.ds(r0, rows_in_chunk), :].astype(jnp.float32)
            d = xs - ts
            sq = d * d
            if masked:
                rows = (row_start + r0) + base
                sq = jnp.where(rows < n_rows, sq, 0.0)
            # (rows_in_chunk, 128) -> (8, 128): pure VALU vreg adds.
            return sq.reshape(rows_in_chunk // SUBLANE, SUBLANE, LANE).sum(axis=0)

        def body(i, acc):
            r0 = pl.multiple_of(i * chunk, chunk)
            return acc + chunk_sum(r0, chunk, base_rows if masked else None)

        acc = jax.lax.fori_loop(0, n_full, body,
                                jnp.zeros((SUBLANE, LANE), jnp.float32))
        if rem:
            base_rem = (jax.lax.broadcasted_iota(jnp.int32, (rem, LANE), 0)
                        if masked else None)
            acc = acc + chunk_sum(n_full * chunk, rem, base_rem)
        return acc

    if not needs_mask:
        psum_ref[...] += accumulate(0, masked=False)
    else:
        blk = c * per_core_blocks + j
        row_start = blk * tm
        is_full = row_start + tm <= n_rows

        @pl.when(is_full)
        def _fast():
            psum_ref[...] += accumulate(0, masked=False)

        @pl.when(jnp.logical_not(is_full))
        def _masked():
            psum_ref[...] += accumulate(row_start, masked=True)


def content_loss_forward(x, target, weight, *, tm_max=8192, chunk=256):
    """Returns (output, loss): output is `x` (pass-through),
    loss = MSE(x * weight, target * weight) = weight^2 * mean((x - target)^2)."""
    assert x.shape == target.shape
    assert tm_max % chunk == 0 and chunk % SUBLANE == 0
    n = x.size
    w2 = jnp.float32(weight) ** 2

    xf = x.reshape(-1)
    tf = target.reshape(-1)

    tail = n % LANE
    n_main = n - tail
    if n_main == 0:
        # Too small for a lane-dense kernel; plain JAX.
        d = xf.astype(jnp.float32) - tf.astype(jnp.float32)
        return x, jnp.sum(d * d) * w2 / jnp.float32(n)

    if tail:
        # TODO(synk): the rare ragged-lane path slices the aligned prefix (one
        # extra copy of the prefix); the tail itself is summed in plain JAX.
        x2 = xf[:n_main].reshape(-1, LANE)
        t2 = tf[:n_main].reshape(-1, LANE)
    else:
        x2 = xf.reshape(-1, LANE)
        t2 = tf.reshape(-1, LANE)
    n_rows = n_main // LANE

    # --- tiling -------------------------------------------------------------
    rows8 = -(-n_rows // SUBLANE) * SUBLANE      # rows rounded up to sublane
    tm = rows8 if rows8 <= tm_max else tm_max    # single block, or tm_max tiles
    chunk_eff = min(chunk, tm)
    nb = -(-n_rows // tm)                        # number of row blocks

    ncores = _num_tensorcores() if nb >= 2 else 1
    per_core_blocks = -(-nb // ncores)
    needs_mask = (ncores * per_core_blocks * tm != n_rows)

    def in_index_map(c, j):
        blk = c * per_core_blocks + j
        # Clamp overflow steps onto the last valid block; they are fully
        # masked inside the kernel so they contribute 0.
        return (jnp.minimum(blk, nb - 1), 0)

    kernel = functools.partial(
        _content_loss_kernel,
        tm=tm, chunk=chunk_eff, n_rows=n_rows,
        per_core_blocks=per_core_blocks, needs_mask=needs_mask)

    # 2 inputs x 2 pipeline buffers, plus headroom for in-kernel temporaries.
    buf_bytes = tm * LANE * (x.dtype.itemsize + target.dtype.itemsize)
    vmem_limit = int(min(2 * buf_bytes + (16 << 20), 100 << 20))

    partials = pl.pallas_call(
        kernel,
        out_shape=jax.ShapeDtypeStruct((ncores, SUBLANE, LANE), jnp.float32),
        grid_spec=pltpu.PrefetchScalarGridSpec(
            num_scalar_prefetch=0,
            grid=(ncores, per_core_blocks),
            in_specs=[
                pl.BlockSpec((tm, LANE), in_index_map),
                pl.BlockSpec((tm, LANE), in_index_map),
            ],
            out_specs=pl.BlockSpec((None, SUBLANE, LANE), lambda c, j: (c, 0, 0)),
        ),
        compiler_params=pltpu.CompilerParams(
            dimension_semantics=("parallel", "arbitrary"),
            vmem_limit_bytes=vmem_limit,
        ),
        cost_estimate=pl.CostEstimate(
            flops=3 * n_main,
            transcendentals=0,
            bytes_accessed=n_main * (x.dtype.itemsize + target.dtype.itemsize)
                           + ncores * SUBLANE * LANE * 4,
        ),
    )(x2, t2)

    total = jnp.sum(partials)
    if tail:
        dt = xf[n_main:].astype(jnp.float32) - tf[n_main:].astype(jnp.float32)
        total = total + jnp.sum(dt * dt)

    loss = total * w2 / jnp.float32(n)
    # Forward returns the input unchanged; no kernel write of the output needed.
    return x, loss


class ContentLossPallas:
    """JAX/Pallas equivalent of the PyTorch Content_Loss module."""

    def __init__(self, target, weight):
        self.weight = float(weight)
        # Store the raw detached target; the weight is folded in analytically
        # at loss time (MSE(w*x, w*t) = w^2 * MSE(x, t)), so no scaled copy is
        # ever materialized in HBM. The target may be passed in bf16 for ~2x
        # HBM-bandwidth savings; accumulation is always f32 in-kernel.
        self.target = jax.lax.stop_gradient(target)
        self.loss = None

    def __call__(self, x):
        output, loss = content_loss_forward(x, self.target, self.weight)
        self.loss = loss
        return output
    # TODO(synk): backward() (autograd .backward on the stored loss) has no direct
    # Pallas equivalent; use jax.grad over content_loss_forward's loss if needed.


if __name__ == "__main__":
    key = jax.random.PRNGKey(0)

    def check(shape, weight, k):
        k1, k2 = jax.random.split(k)
        x = jax.random.normal(k1, shape, dtype=jnp.float32)
        t = jax.random.normal(k2, shape, dtype=jnp.float32)
        module = ContentLossPallas(t, weight)
        out = module(x)
        out, loss = jax.block_until_ready((out, module.loss))
        ref = jnp.mean((x * weight - t * weight) ** 2)
        assert jnp.allclose(out, x), f"pass-through output mismatch for {shape}"
        assert jnp.allclose(loss, ref, rtol=1e-4, atol=1e-6), (
            f"loss mismatch for {shape}: {loss} vs {ref}")

    keys = jax.random.split(key, 3)
    # Primary small NCHW conv-feature-map case (lane-aligned, single block).
    check((2, 4, 16, 16), 0.5, keys[0])
    # Ragged case: element count not a multiple of 128, rows not a multiple of 8.
    check((1, 3, 50, 50), 1.25, keys[1])
    # Larger case exercising multiple row blocks, the resident accumulator and
    # (on 2-TC chips) the parallel core split + masked last block.
    check((2, 160, 64, 64), 0.75, keys[2])

    print("KERNEL_OK")
</pallas_src>

<mosaic_0001>
module attributes {stable_mosaic.version = 11 : i64} {
  func.func @_content_loss_kernel(%arg0: i32, %arg1: i32, %arg2: memref<16x128xf32, #tpu.memory_space<vmem>>, %arg3: memref<16x128xf32, #tpu.memory_space<vmem>>, %arg4: memref<1x8x128xf32, #tpu.memory_space<vmem>>) attributes {dimension_semantics = [#tpu.dimension_semantics<parallel>, #tpu.dimension_semantics<arbitrary>], iteration_bounds = array<i64: 1, 1>, scalar_prefetch = 0 : i64, scratch_operands = 0 : i64, tpu.core_type = #tpu.core_type<tc>, window_params = [{transform_indices = @transform_0, window_bounds = array<i64: 16, 128>}, {transform_indices = @transform_1, window_bounds = array<i64: 16, 128>}, {transform_indices = @transform_2, window_bounds = array<i64: 1, 8, 128>}]} {
    %c0_i32 = arith.constant 0 : i32
    %0 = arith.cmpi eq, %arg1, %c0_i32 : i32
    %1 = arith.extui %0 : i1 to i32
    %c0_i32_0 = arith.constant 0 : i32
    %2 = arith.cmpi ne, %1, %c0_i32_0 : i32
    scf.if %2 {
      %cst_10 = arith.constant 0.000000e+00 : f32
      %21 = vector.broadcast %cst_10 : f32 to vector<8x128xf32>
      %c0_11 = arith.constant 0 : index
      %c0_12 = arith.constant 0 : index
      %c0_13 = arith.constant 0 : index
      %22 = vector.load %arg4[%c0_11, %c0_12, %c0_13] : memref<1x8x128xf32, #tpu.memory_space<vmem>>, vector<1x8x128xf32>
      %23 = vector.shape_cast %22 : vector<1x8x128xf32> to vector<8x128xf32>
      %24 = vector.shape_cast %21 : vector<8x128xf32> to vector<1x8x128xf32>
      tpu.vector_store %arg4[%c0_11, %c0_12, %c0_13], %24 {strides = array<i32>} : memref<1x8x128xf32, #tpu.memory_space<vmem>>, vector<1x8x128xf32>,
    } else {
    }
    %c0 = arith.constant 0 : index
    %c0_1 = arith.constant 0 : index
    %c0_2 = arith.constant 0 : index
    %3 = vector.load %arg4[%c0, %c0_1, %c0_2] : memref<1x8x128xf32, #tpu.memory_space<vmem>>, vector<1x8x128xf32>
    %4 = vector.shape_cast %3 : vector<1x8x128xf32> to vector<8x128xf32>
    %cst = arith.constant 0.000000e+00 : f32
    %5 = vector.broadcast %cst : f32 to vector<8x128xf32>
    %c0_i32_3 = arith.constant 0 : i32
    %c16_i32 = arith.constant 16 : i32
    %6 = arith.muli %c0_i32_3, %c16_i32 : i32
    %7 = tpu.assume_multiple %6, 16 : i32
    %8 = arith.index_cast %7 : i32 to index
    %c0_4 = arith.constant 0 : index
    %9 = vector.load %arg2[%8, %c0_4] : memref<16x128xf32, #tpu.memory_space<vmem>>, vector<16x128xf32>
    %10 = arith.index_cast %7 : i32 to index
    %c0_5 = arith.constant 0 : index
    %11 = vector.load %arg3[%10, %c0_5] : memref<16x128xf32, #tpu.memory_space<vmem>>, vector<16x128xf32>
    %12 = arith.subf %9, %11 : vector<16x128xf32>
    %13 = arith.mulf %12, %12 : vector<16x128xf32>
    %14 = vector.shape_cast %13 : vector<16x128xf32> to vector<2x8x128xf32>
    %cst_6 = arith.constant dense<0.000000e+00> : vector<8x128xf32>
    %15 = vector.multi_reduction <add>, %14, %cst_6 [0] : vector<2x8x128xf32> to vector<8x128xf32>
    %16 = arith.addf %5, %15 : vector<8x128xf32>
    %c1_i32 = arith.constant 1 : i32
    %17 = arith.addf %4, %16 : vector<8x128xf32>
    %c0_7 = arith.constant 0 : index
    %c0_8 = arith.constant 0 : index
    %c0_9 = arith.constant 0 : index
    %18 = vector.load %arg4[%c0_7, %c0_8, %c0_9] : memref<1x8x128xf32, #tpu.memory_space<vmem>>, vector<1x8x128xf32>
    %19 = vector.shape_cast %18 : vector<1x8x128xf32> to vector<8x128xf32>
    %20 = vector.shape_cast %17 : vector<8x128xf32> to vector<1x8x128xf32>
    tpu.vector_store %arg4[%c0_7, %c0_8, %c0_9], %20 {strides = array<i32>} : memref<1x8x128xf32, #tpu.memory_space<vmem>>, vector<1x8x128xf32>,
    return
  }
  func.func @transform_0(%arg0: i32, %arg1: i32) -> (i32, i32) {
    %c1_i32 = arith.constant 1 : i32
    %0 = arith.muli %arg0, %c1_i32 : i32
    %1 = arith.addi %0, %arg1 : i32
    %c0_i32 = arith.constant 0 : i32
    %2 = arith.minsi %1, %c0_i32 : i32
    %c0_i32_0 = arith.constant 0 : i32
    %c0_i32_1 = arith.constant 0 : i32
    return %2, %c0_i32_0 : i32, i32
  }
  func.func @transform_1(%arg0: i32, %arg1: i32) -> (i32, i32) {
    %c1_i32 = arith.constant 1 : i32
    %0 = arith.muli %arg0, %c1_i32 : i32
    %1 = arith.addi %0, %arg1 : i32
    %c0_i32 = arith.constant 0 : i32
    %2 = arith.minsi %1, %c0_i32 : i32
    %c0_i32_0 = arith.constant 0 : i32
    %c0_i32_1 = arith.constant 0 : i32
    return %2, %c0_i32_0 : i32, i32
  }
  func.func @transform_2(%arg0: i32, %arg1: i32) -> (i32, i32, i32) {
    %c0_i32 = arith.constant 0 : i32
    %c0_i32_0 = arith.constant 0 : i32
    %c0_i32_1 = arith.constant 0 : i32
    return %arg0, %c0_i32, %c0_i32_0 : i32, i32, i32
  }
}

</mosaic_0001>

<bundles_post_ra>
// kernel: tpu_custom_call.1
= control target key start
LH: loop header
LB: loop body
LE: loop exit
PB: predicated region body
PF: predicated region fallthrough
CT: control target
= control target key end

     0   :  { %7 = vsyncpa [#allocation3], 0  ;;  %s232_s0 = inlined_call_operand.hbm [shape: f32[16,128], index: 0, kind: input, shape index: {}]   ;;  %s233_s1 = inlined_call_operand.hbm [shape: f32[16,128], index: 1, kind: input, shape index: {}]   ;;  %s234_s2 = inlined_call_operand.hbm [shape: f32[1,8,128], index: 2, kind: output, shape index: {}]  }
   0x1   :  { %8 = vsyncpa [#allocation6], 0 }
   0x2   :  { %9 = vsyncpa [#allocation4], 0  ;;  %s176_s9 = smov [#allocation2]   ;;  %s104_s13 = scalar_lea.hbm %s232_s0, 256 }
   0x3   :  { %s21_s10 = sshll.u32 %s176_s9, 4  ;;  %p105_p0 = scmp.ne.s32.totalorder %s232_s0, %s104_s13  ;;  %s22_s10 = int_to_ptr.vmem [resolvable:$true] %s21_s10 }
   0x4   :  { %p108_p1 = scmp.lt.u32.totalorder %s104_s13, %s232_s0 }
   0x6   :  { %p110_p2 = pnand %p108_p1, %p105_p0 }
   0x8   :  { %113 = shalt.err (!%p110_p2)
}
   0x9   :  { %s114_s18 = scalar_lea.vmem %s22_s10, 256  ;;  %p119_p4 = scmp.lt.s32.totalorder %s22_s10, %s22_s10 }
   0xa   :  { %p115_p3 = scmp.ne.s32.totalorder %s22_s10, %s114_s18  ;;  %p120_p5 = scmp.lt.s32.totalorder %s114_s18, %s114_s18 }
   0xc   :  { %p121_p6 = por %p120_p5, %p119_p4 }
   0xe   :  { %p122_p7 = pnand %p121_p6, %p115_p3 }
  0x10   :  { %125 = shalt.err (!%p122_p7)
}
  0x11   :  { %s177_s19 = smov 128   ;;  %s178_s20 = smov 8  }
  0x12   :  { %27 = dma.hbm_to_vmem [thread:$0]  %s232_s0, 256, %s22_s10, [#allocation3], %s177_s19, %s177_s19, %s178_s20  }
  0x13   :  { %s179_s23 = smov [#allocation5]   ;;  %s126_s27 = scalar_lea.hbm %s233_s1, 256 }
  0x14   :  { %s39_s24 = sshll.u32 %s179_s23, 4  ;;  %p127_p8 = scmp.ne.s32.totalorder %s233_s1, %s126_s27  ;;  %s40_s24 = int_to_ptr.vmem [resolvable:$true] %s39_s24 }
  0x15   :  { %p130_p9 = scmp.lt.u32.totalorder %s126_s27, %s233_s1 }
  0x17   :  { %p132_p10 = pnand %p130_p9, %p127_p8 }
  0x19   :  { %135 = shalt.err (!%p132_p10)
}
  0x1a   :  { %s136_s4 = scalar_lea.vmem %s40_s24, 256  ;;  %p141_p12 = scmp.lt.s32.totalorder %s40_s24, %s40_s24 }
  0x1b   :  { %p137_p11 = scmp.ne.s32.totalorder %s40_s24, %s136_s4  ;;  %p142_p13 = scmp.lt.s32.totalorder %s136_s4, %s136_s4 }
  0x1d   :  { %p143_p0 = por %p142_p13, %p141_p12 }
  0x1f   :  { %p144_p1 = pnand %p143_p0, %p137_p11 }
  0x21   :  { %147 = shalt.err (!%p144_p1)
}
  0x22   :  { %45 = dma.hbm_to_vmem [thread:$0]  %s233_s1, 256, %s40_s24, [#allocation6], %s177_s19, %s177_s19, %s178_s20  }
  0x23   :  { %170 = dma.done.wait [#allocation3], 256  }
  0x24   :  { %171 = vsyncadd [#allocation3], 4294967040 }
  0x25   :  { %172 = dma.done.wait [#allocation6], 256  }
  0x26   :  { %173 = vsyncadd [#allocation6], 4294967040  ;;  %v66_v0 = vld [vmem:[#allocation2] sm:$0xff]  ;;  %v67_v1 = vld [vmem:[#allocation2 + $0x8] sm:$0xff]  ;;  %s180_s6 = smov [#allocation7]  }
  0x27   :  { %v68_v2 = vld [vmem:[#allocation5] sm:$0xff]  ;;  %v69_v3 = vld [vmem:[#allocation5 + $0x8] sm:$0xff]  ;;  %s84_s7 = sshll.u32 %s180_s6, 4  ;;  %s85_s7 = int_to_ptr.vmem [resolvable:$true] %s84_s7 }
  0x28   :  { %v70_v4 = vsub.f32 %v66_v0, %v68_v2  ;;  %v71_v5 = vsub.f32 %v67_v1, %v69_v3  ;;  %s148_s8 = scalar_lea.vmem %s85_s7, 128  ;;  %p153_p3 = scmp.lt.s32.totalorder %s85_s7, %s85_s7 }
  0x29   :  { %p149_p2 = scmp.ne.s32.totalorder %s85_s7, %s148_s8  ;;  %p154_p4 = scmp.lt.s32.totalorder %s148_s8, %s148_s8 }
  0x2a   :  { %v72_v6 = vmul.f32 %v70_v4, %v70_v4  ;;  %v73_v7 = vmul.f32 %v71_v5, %v71_v5 }
  0x2b   :  { %p155_p5 = por %p154_p4, %p153_p3 }
  0x2c   :  { %v74_v8 = vadd.f32 %v73_v7, %v72_v6 }
  0x2d   :  { %p156_p6 = pnand %p155_p5, %p149_p2 }
  0x2e   :  { %77 = vst [vmem:[#allocation7] sm:$0xff] %v74_v8 }
  0x2f   :  { %159 = shalt.err (!%p156_p6)
}
  0x30   :  { %s160_s10 = scalar_lea.hbm %s234_s2, 128 }
  0x31   :  { %p161_p7 = scmp.ne.s32.totalorder %s234_s2, %s160_s10  ;;  %p164_p8 = scmp.lt.u32.totalorder %s160_s10, %s234_s2 }
  0x33   :  { %p166_p9 = pnand %p164_p8, %p161_p7 }
  0x35   :  { %169 = shalt.err (!%p166_p9)
}
  0x36   :  { %87 = dma.vmem_to_hbm [thread:$0]  %s85_s7, 128, %s234_s2, [#allocation4]  }
  0x37   :  { %174 = dma.done.wait [#allocation4], 128  }
  0x38   :  { %175 = vsyncadd [#allocation4], 4294967168 }
  0x39   :  { %91 = vsyncpa [#allocation3], 1 }
  0x3a   :  { %92 = vsyncpa [#allocation6], 1 }
  0x3b   :  { %93 = vsyncpa [#allocation4], 1 }

</bundles_post_ra>
